<compile_context>
chip_gen: v7x
topology: tpu7x:2x2x1
jax: 0.10.0
libtpu: 0.0.40
codegen_flags: <defaults>
</compile_context>

<pallas_src>
import jax
import jax.numpy as jnp
from jax.experimental import pallas as pl
from jax.experimental.pallas import tpu as pltpu


def _round_up(n, m):
    return ((n + m - 1) // m) * m


def _elementwise_kernel(x_ref, add_ref, sub_ref, mul_ref, div_ref):
    x = x_ref[...]
    add_ref[...] = x + 2.0
    sub_ref[...] = x - 2.0
    mul_ref[...] = x * 2.0
    # torch.div with a scalar is true division; * 0.5 is exact for floats.
    div_ref[...] = x * 0.5


def pt_module_forward(x):
    """Returns (x+2, x-2, x*2, x/2) computed in a single Pallas kernel."""
    dtype = x.dtype
    if not jnp.issubdtype(dtype, jnp.floating):
        # TODO(synk): integer inputs need torch-style promotion (add/sub/mul stay
        # integral, div promotes to float32); only floating dtypes supported here.
        raise NotImplementedError("pt_module_forward only supports floating dtypes")

    orig_shape = x.shape
    total = x.size

    LANE = 128
    itemsize = jnp.dtype(dtype).itemsize
    # Sublane alignment by dtype packing: f32 -> 8, bf16 -> 16, int8/fp8 -> 32.
    sublane = max(8, 32 // itemsize)

    rows = pl.cdiv(max(total, 1), LANE)
    padded_rows = _round_up(rows, sublane)
    padded_total = padded_rows * LANE

    x_flat = jnp.ravel(x)
    if padded_total != total:
        # Small pad only (to lane/sublane alignment), never a full extra tile.
        x_flat = jnp.pad(x_flat, (0, padded_total - total))
    x2d = x_flat.reshape(padded_rows, LANE)

    # ~2 MiB (f32) input tile; Pallas clips the ragged last tile if padded_rows
    # is not a multiple of tile_rows, so no tile-sized padding is needed.
    MAX_TILE_ROWS = 4096
    tile_rows = min(MAX_TILE_ROWS, padded_rows)
    num_tiles = pl.cdiv(padded_rows, tile_rows)

    tile_spec = lambda: pl.BlockSpec((tile_rows, LANE), lambda i: (i, 0))

    outs = pl.pallas_call(
        _elementwise_kernel,
        out_shape=tuple(
            jax.ShapeDtypeStruct((padded_rows, LANE), dtype) for _ in range(4)
        ),
        grid=(num_tiles,),
        in_specs=[tile_spec()],
        out_specs=tuple(tile_spec() for _ in range(4)),
        compiler_params=pltpu.CompilerParams(
            dimension_semantics=("parallel",),
            vmem_limit_bytes=48 << 20,
        ),
        cost_estimate=pl.CostEstimate(
            flops=4 * total,
            transcendentals=0,
            bytes_accessed=5 * x.nbytes,
        ),
    )(x2d)

    results = []
    for o in outs:
        if padded_total != total:
            o = o.reshape(padded_total)[:total]
        results.append(o.reshape(orig_shape))
    return tuple(results)


if __name__ == "__main__":
    key = jax.random.PRNGKey(0)
    # Small shape consistent with a generic NCHW tensor: batch=2, channels=4, 16x16
    x = jax.random.normal(key, (2, 4, 16, 16), dtype=jnp.float32)

    add_o, sub_o, mul_o, div_o = pt_module_forward(x)
    jax.block_until_ready((add_o, sub_o, mul_o, div_o))

    # Correctness check against plain JAX reference
    assert jnp.allclose(add_o, x + 2)
    assert jnp.allclose(sub_o, x - 2)
    assert jnp.allclose(mul_o, x * 2)
    assert jnp.allclose(div_o, x / 2)

    print("KERNEL_OK")
</pallas_src>

<mosaic_0001>
module attributes {stable_mosaic.version = 11 : i64} {
  func.func @_elementwise_kernel(%arg0: i32, %arg1: memref<16x128xf32, #tpu.memory_space<vmem>>, %arg2: memref<16x128xf32, #tpu.memory_space<vmem>>, %arg3: memref<16x128xf32, #tpu.memory_space<vmem>>, %arg4: memref<16x128xf32, #tpu.memory_space<vmem>>, %arg5: memref<16x128xf32, #tpu.memory_space<vmem>>) attributes {dimension_semantics = [#tpu.dimension_semantics<parallel>], iteration_bounds = array<i64: 1>, scalar_prefetch = 0 : i64, scratch_operands = 0 : i64, tpu.core_type = #tpu.core_type<tc>, window_params = [{transform_indices = @transform_0, window_bounds = array<i64: 16, 128>}, {transform_indices = @transform_1, window_bounds = array<i64: 16, 128>}, {transform_indices = @transform_2, window_bounds = array<i64: 16, 128>}, {transform_indices = @transform_3, window_bounds = array<i64: 16, 128>}, {transform_indices = @transform_4, window_bounds = array<i64: 16, 128>}]} {
    %c0 = arith.constant 0 : index
    %c0_0 = arith.constant 0 : index
    %0 = vector.load %arg1[%c0, %c0_0] : memref<16x128xf32, #tpu.memory_space<vmem>>, vector<16x128xf32>
    %cst = arith.constant 2.000000e+00 : f32
    %1 = vector.broadcast %cst : f32 to vector<16x128xf32>
    %2 = arith.addf %0, %1 : vector<16x128xf32>
    %c0_1 = arith.constant 0 : index
    %c0_2 = arith.constant 0 : index
    %3 = vector.load %arg2[%c0_1, %c0_2] : memref<16x128xf32, #tpu.memory_space<vmem>>, vector<16x128xf32>
    tpu.vector_store %arg2[%c0_1, %c0_2], %2 {strides = array<i32>} : memref<16x128xf32, #tpu.memory_space<vmem>>, vector<16x128xf32>,
    %cst_3 = arith.constant 2.000000e+00 : f32
    %4 = vector.broadcast %cst_3 : f32 to vector<16x128xf32>
    %5 = arith.subf %0, %4 : vector<16x128xf32>
    %c0_4 = arith.constant 0 : index
    %c0_5 = arith.constant 0 : index
    %6 = vector.load %arg3[%c0_4, %c0_5] : memref<16x128xf32, #tpu.memory_space<vmem>>, vector<16x128xf32>
    tpu.vector_store %arg3[%c0_4, %c0_5], %5 {strides = array<i32>} : memref<16x128xf32, #tpu.memory_space<vmem>>, vector<16x128xf32>,
    %cst_6 = arith.constant 2.000000e+00 : f32
    %7 = vector.broadcast %cst_6 : f32 to vector<16x128xf32>
    %8 = arith.mulf %0, %7 : vector<16x128xf32>
    %c0_7 = arith.constant 0 : index
    %c0_8 = arith.constant 0 : index
    %9 = vector.load %arg4[%c0_7, %c0_8] : memref<16x128xf32, #tpu.memory_space<vmem>>, vector<16x128xf32>
    tpu.vector_store %arg4[%c0_7, %c0_8], %8 {strides = array<i32>} : memref<16x128xf32, #tpu.memory_space<vmem>>, vector<16x128xf32>,
    %cst_9 = arith.constant 5.000000e-01 : f32
    %10 = vector.broadcast %cst_9 : f32 to vector<16x128xf32>
    %11 = arith.mulf %0, %10 : vector<16x128xf32>
    %c0_10 = arith.constant 0 : index
    %c0_11 = arith.constant 0 : index
    %12 = vector.load %arg5[%c0_10, %c0_11] : memref<16x128xf32, #tpu.memory_space<vmem>>, vector<16x128xf32>
    tpu.vector_store %arg5[%c0_10, %c0_11], %11 {strides = array<i32>} : memref<16x128xf32, #tpu.memory_space<vmem>>, vector<16x128xf32>,
    return
  }
  func.func @transform_0(%arg0: i32) -> (i32, i32) {
    %c0_i32 = arith.constant 0 : i32
    %c0_i32_0 = arith.constant 0 : i32
    return %arg0, %c0_i32 : i32, i32
  }
  func.func @transform_1(%arg0: i32) -> (i32, i32) {
    %c0_i32 = arith.constant 0 : i32
    %c0_i32_0 = arith.constant 0 : i32
    return %arg0, %c0_i32 : i32, i32
  }
  func.func @transform_2(%arg0: i32) -> (i32, i32) {
    %c0_i32 = arith.constant 0 : i32
    %c0_i32_0 = arith.constant 0 : i32
    return %arg0, %c0_i32 : i32, i32
  }
  func.func @transform_3(%arg0: i32) -> (i32, i32) {
    %c0_i32 = arith.constant 0 : i32
    %c0_i32_0 = arith.constant 0 : i32
    return %arg0, %c0_i32 : i32, i32
  }
  func.func @transform_4(%arg0: i32) -> (i32, i32) {
    %c0_i32 = arith.constant 0 : i32
    %c0_i32_0 = arith.constant 0 : i32
    return %arg0, %c0_i32 : i32, i32
  }
}

</mosaic_0001>

<bundles_post_ra>
// kernel: tpu_custom_call.1
= control target key start
LH: loop header
LB: loop body
LE: loop exit
PB: predicated region body
PF: predicated region fallthrough
CT: control target
= control target key end

     0   :  { %10 = vsyncpa [#allocation3], 0  ;;  %s373_s0 = inlined_call_operand.hbm [shape: f32[16,128], index: 0, kind: input, shape index: {}]   ;;  %s374_s1 = inlined_call_operand.hbm [shape: f32[16,128], index: 1, kind: output, shape index: {0}]   ;;  %s375_s2 = inlined_call_operand.hbm [shape: f32[16,128], index: 2, kind: output, shape index: {1}]   ;;  %s376_s3 = inlined_call_operand.hbm [shape: f32[16,128], index: 3, kind: output, shape index: {2}]   ;;  %s377_s4 = inlined_call_operand.hbm [shape: f32[16,128], index: 4, kind: output, shape index: {3}]  }
   0x1   :  { %11 = vsyncpa [#allocation4], 0 }
   0x2   :  { %12 = vsyncpa [#allocation7], 0 }
   0x3   :  { %13 = vsyncpa [#allocation10], 0  ;;  %s238_s15 = smov [#allocation2]   ;;  %s120_s19 = scalar_lea.hbm %s373_s0, 256 }
   0x4   :  { %s19_s16 = sshll.u32 %s238_s15, 4  ;;  %p121_p0 = scmp.ne.s32.totalorder %s373_s0, %s120_s19  ;;  %s20_s16 = int_to_ptr.vmem [resolvable:$true] %s19_s16 }
   0x5   :  { %p124_p1 = scmp.lt.u32.totalorder %s120_s19, %s373_s0 }
   0x7   :  { %p126_p2 = pnand %p124_p1, %p121_p0 }
   0x9   :  { %129 = shalt.err (!%p126_p2)
}
   0xa   :  { %s130_s24 = scalar_lea.vmem %s20_s16, 256  ;;  %p135_p4 = scmp.lt.s32.totalorder %s20_s16, %s20_s16 }
   0xb   :  { %p131_p3 = scmp.ne.s32.totalorder %s20_s16, %s130_s24  ;;  %p136_p5 = scmp.lt.s32.totalorder %s130_s24, %s130_s24 }
   0xd   :  { %p137_p6 = por %p136_p5, %p135_p4 }
   0xf   :  { %p138_p7 = pnand %p137_p6, %p131_p3 }
  0x11   :  { %141 = shalt.err (!%p138_p7)
}
  0x12   :  { %s239_s25 = smov 128   ;;  %s240_s26 = smov 8  }
  0x13   :  { %25 = dma.hbm_to_vmem [thread:$0]  %s373_s0, 256, %s20_s16, [#allocation3], %s239_s25, %s239_s25, %s240_s26  }
  0x14   :  { %230 = dma.done.wait [#allocation3], 256  }
  0x15   :  { %231 = vsyncadd [#allocation3], 4294967040  ;;  %s241_s29 = smov [#allocation6]   ;;  %s242_s5 = smov [#allocation5]   ;;  %v29_v0 = vld [vmem:[#allocation2] sm:$0xff]  ;;  %v30_v1 = vld [vmem:[#allocation2 + $0x8] sm:$0xff] }
  0x16   :  { %s64_s30 = sshll.u32 %s241_s29, 4  ;;  %s52_s6 = sshll.u32 %s242_s5, 4  ;;  %v111_v2 = vadd.f32 -2.0, %v29_v0  ;;  %v112_v3 = vadd.f32 -2.0, %v30_v1  ;;  %v31_v4 = vadd.f32 2.0, %v29_v0  ;;  %v32_v5 = vadd.f32 2.0, %v30_v1  ;;  %s285_s30 = int_to_ptr.vmem [resolvable:$true] %s64_s30  ;;  %s287_s6 = int_to_ptr.vmem [resolvable:$true] %s52_s6 }
  0x17   :  { %s243_s7 = smov [#allocation8]   ;;  %s244_s9 = smov [#allocation9]   ;;  %v39_v6 = vmul.f32 2.0, %v29_v0  ;;  %v40_v7 = vmul.f32 2.0, %v30_v1  ;;  %v43_v8 = vmul.f32 0.5, %v29_v0  ;;  %v44_v9 = vmul.f32 0.5, %v30_v1 }
  0x18   :  { %s76_s8 = sshll.u32 %s243_s7, 4  ;;  %s88_s10 = sshll.u32 %s244_s9, 4  ;;  %37 = vst [vmem:[#allocation6] sm:$0xff] %v111_v2  ;;  %38 = vst [vmem:[#allocation6 + $0x8] sm:$0xff] %v112_v3  ;;  %s289_s8 = int_to_ptr.vmem [resolvable:$true] %s76_s8  ;;  %s291_s10 = int_to_ptr.vmem [resolvable:$true] %s88_s10 }
  0x19   :  { %33 = vst [vmem:[#allocation5] sm:$0xff] %v31_v4  ;;  %34 = vst [vmem:[#allocation5 + $0x8] sm:$0xff] %v32_v5  ;;  %s142_s0 = scalar_lea.vmem %s285_s30, 256  ;;  %p147_p9 = scmp.lt.s32.totalorder %s285_s30, %s285_s30 }
  0x1a   :  { %41 = vst [vmem:[#allocation8] sm:$0xff] %v39_v6  ;;  %42 = vst [vmem:[#allocation8 + $0x8] sm:$0xff] %v40_v7  ;;  %p143_p8 = scmp.ne.s32.totalorder %s285_s30, %s142_s0  ;;  %p148_p10 = scmp.lt.s32.totalorder %s142_s0, %s142_s0 }
  0x1b   :  { %45 = vst [vmem:[#allocation9] sm:$0xff] %v43_v8  ;;  %46 = vst [vmem:[#allocation9 + $0x8] sm:$0xff] %v44_v9 }
  0x1c   :  { %p149_p11 = por %p148_p10, %p147_p9 }
  0x1e   :  { %p150_p12 = pnand %p149_p11, %p143_p8 }
  0x20   :  { %153 = shalt.err (!%p150_p12)
}
  0x21   :  { %s154_s13 = scalar_lea.hbm %s375_s2, 256 }
  0x22   :  { %p155_p13 = scmp.ne.s32.totalorder %s375_s2, %s154_s13  ;;  %p158_p0 = scmp.lt.u32.totalorder %s154_s13, %s375_s2 }
  0x24   :  { %p160_p1 = pnand %p158_p0, %p155_p13 }
  0x26   :  { %163 = shalt.err (!%p160_p1)
}
  0x27   :  { %70 = dma.vmem_to_hbm [thread:$0]  %s285_s30, 256, %s375_s2, [#allocation7], %s239_s25, %s239_s25, %s240_s26  }
  0x28   :  { %s164_s20 = scalar_lea.vmem %s287_s6, 256  ;;  %p169_p3 = scmp.lt.s32.totalorder %s287_s6, %s287_s6 }
  0x29   :  { %p165_p2 = scmp.ne.s32.totalorder %s287_s6, %s164_s20  ;;  %p170_p4 = scmp.lt.s32.totalorder %s164_s20, %s164_s20 }
  0x2b   :  { %p171_p5 = por %p170_p4, %p169_p3 }
  0x2d   :  { %p172_p6 = pnand %p171_p5, %p165_p2 }
  0x2f   :  { %175 = shalt.err (!%p172_p6)
}
  0x30   :  { %s176_s23 = scalar_lea.hbm %s374_s1, 256 }
  0x31   :  { %p177_p7 = scmp.ne.s32.totalorder %s374_s1, %s176_s23  ;;  %p180_p8 = scmp.lt.u32.totalorder %s176_s23, %s374_s1 }
  0x33   :  { %p182_p9 = pnand %p180_p8, %p177_p7 }
  0x35   :  { %185 = shalt.err (!%p182_p9)
}
  0x36   :  { %58 = dma.vmem_to_hbm [thread:$0]  %s287_s6, 256, %s374_s1, [#allocation4], %s239_s25, %s239_s25, %s240_s26  }
  0x37   :  { %s186_s5 = scalar_lea.vmem %s289_s8, 256  ;;  %p191_p11 = scmp.lt.s32.totalorder %s289_s8, %s289_s8 }
  0x38   :  { %p187_p10 = scmp.ne.s32.totalorder %s289_s8, %s186_s5  ;;  %p192_p12 = scmp.lt.s32.totalorder %s186_s5, %s186_s5 }
  0x3a   :  { %p193_p13 = por %p192_p12, %p191_p11 }
  0x3c   :  { %p194_p0 = pnand %p193_p13, %p187_p10 }
  0x3e   :  { %197 = shalt.err (!%p194_p0)
}
  0x3f   :  { %s198_s0 = scalar_lea.hbm %s376_s3, 256 }
  0x40   :  { %p199_p1 = scmp.ne.s32.totalorder %s376_s3, %s198_s0  ;;  %p202_p2 = scmp.lt.u32.totalorder %s198_s0, %s376_s3 }
  0x42   :  { %p204_p3 = pnand %p202_p2, %p199_p1 }
  0x44   :  { %207 = shalt.err (!%p204_p3)
}
  0x45   :  { %82 = dma.vmem_to_hbm [thread:$0]  %s289_s8, 256, %s376_s3, [#allocation7], %s239_s25, %s239_s25, %s240_s26  }
  0x46   :  { %s208_s15 = scalar_lea.vmem %s291_s10, 256  ;;  %p213_p5 = scmp.lt.s32.totalorder %s291_s10, %s291_s10 }
  0x47   :  { %p209_p4 = scmp.ne.s32.totalorder %s291_s10, %s208_s15  ;;  %p214_p6 = scmp.lt.s32.totalorder %s208_s15, %s208_s15 }
  0x49   :  { %p215_p7 = por %p214_p6, %p213_p5 }
  0x4b   :  { %p216_p8 = pnand %p215_p7, %p209_p4 }
  0x4d   :  { %219 = shalt.err (!%p216_p8)
}
  0x4e   :  { %s220_s18 = scalar_lea.hbm %s377_s4, 256 }
  0x4f   :  { %p221_p9 = scmp.ne.s32.totalorder %s377_s4, %s220_s18  ;;  %p224_p10 = scmp.lt.u32.totalorder %s220_s18, %s377_s4 }
  0x51   :  { %p226_p11 = pnand %p224_p10, %p221_p9 }
  0x53   :  { %229 = shalt.err (!%p226_p11)
}
  0x54   :  { %94 = dma.vmem_to_hbm [thread:$0]  %s291_s10, 256, %s377_s4, [#allocation10], %s239_s25, %s239_s25, %s240_s26  }
  0x55   :  { %232 = dma.done.wait [#allocation4], 256  }
  0x56   :  { %233 = vsyncadd [#allocation4], 4294967040 }
  0x57   :  { %234 = dma.done.wait [#allocation7], 512  }
  0x58   :  { %235 = vsyncadd [#allocation7], 4294966784 }
  0x59   :  { %236 = dma.done.wait [#allocation10], 256  }
  0x5a   :  { %237 = vsyncadd [#allocation10], 4294967040 }
  0x5b   :  { %107 = vsyncpa [#allocation3], 1 }
  0x5c   :  { %108 = vsyncpa [#allocation4], 1 }
  0x5d   :  { %109 = vsyncpa [#allocation7], 1 }
  0x5e   :  { %110 = vsyncpa [#allocation10], 1 }

</bundles_post_ra>
